<compile_context>
chip_gen: v5e
topology: v5e:2x2
jax: 0.10.0
libtpu: 0.0.40
codegen_flags: <defaults>
</compile_context>

<pallas_src>
import jax
import jax.numpy as jnp
from jax.experimental import pallas as pl
from jax.experimental.pallas import tpu as pltpu


def mlp_kernel(x_ref, p_ref, o_ref):
    """x_ref: (1, N_pad) f32, batch on lanes.
    p_ref: (H, 4) f32 packed params: [:,0]=w1, [:,1]=b1, [:,2]=w2, [:,3]=b2 (replicated).
    o_ref: (1, N_pad) f32, lane-dense output.
    """
    x = x_ref[...]                     # (1, N_pad)
    p = p_ref[...]                     # (H, 4)

    w1 = p[:, 0:1]                     # (H, 1)
    b1 = p[:, 1:2]                     # (H, 1)
    w2 = p[:, 2:3]                     # (H, 1)
    b2 = p[0:1, 3:4]                   # (1, 1)

    # Layer 1: K=1 contraction == outer product -> VPU broadcast multiply + add.
    h = jnp.maximum(w1 * x + b1, 0.0)  # (H, N_pad), ReLU on VPU

    # Layer 2: output width 1 -> weighted sublane reduction over H (XLU) + bias.
    y = jnp.sum(h * w2, axis=0, keepdims=True) + b2   # (1, N_pad)

    o_ref[...] = y.astype(o_ref.dtype)


def net_forward(x, w1, b1, w2, b2):
    """PyTorch-facing contract.

    x: (N, 1) f32.  w1: (1, H), b1: (1, H), w2: (H, 1), b2: (1, 1).
    Returns y: (N, 1) f32 == relu(x @ w1 + b1) @ w2 + b2.
    """
    n = x.shape[0]
    hdim = w1.shape[1]
    n_pad = ((n + 127) // 128) * 128   # lane-align the batch dimension

    # Lane-dense working layout: batch on lanes, zero-padded to n_pad.
    xt = jnp.zeros((1, n_pad), jnp.float32).at[0, :n].set(x[:, 0])

    # Pack all parameters into a single (H, 4) operand (one DMA).
    params = jnp.stack(
        [w1[0, :], b1[0, :], w2[:, 0], jnp.full((hdim,), b2[0, 0], jnp.float32)],
        axis=1,
    ).astype(jnp.float32)              # (H, 4)

    yt = pl.pallas_call(
        mlp_kernel,
        out_shape=jax.ShapeDtypeStruct((1, n_pad), jnp.float32),
        in_specs=[
            pl.BlockSpec(memory_space=pltpu.VMEM),   # x^T, (1, N_pad)
            pl.BlockSpec(memory_space=pltpu.VMEM),   # packed params, (H, 4)
        ],
        out_specs=pl.BlockSpec(memory_space=pltpu.VMEM),
    )(xt, params)

    # Back to the external (N, 1) contract.
    return yt[0, :n].reshape(n, 1)


def init_params(key, n_features, n_hidden, n_output):
    """Deterministic init matching torch.nn.Linear's U(-1/sqrt(fan_in), 1/sqrt(fan_in))."""
    k1, k2, k3, k4 = jax.random.split(key, 4)
    bound1 = 1.0 / jnp.sqrt(jnp.float32(n_features))
    bound2 = 1.0 / jnp.sqrt(jnp.float32(n_hidden))
    w1 = jax.random.uniform(k1, (n_features, n_hidden), jnp.float32, -bound1, bound1)
    b1 = jax.random.uniform(k2, (1, n_hidden), jnp.float32, -bound1, bound1)
    w2 = jax.random.uniform(k3, (n_hidden, n_output), jnp.float32, -bound2, bound2)
    b2 = jax.random.uniform(k4, (1, n_output), jnp.float32, -bound2, bound2)
    return w1, b1, w2, b2


if __name__ == "__main__":
    n_features, n_hidden, n_output = 1, 32, 1
    n_points = 100  # mirrors torch.linspace(-1, 1, 100).unsqueeze(1)

    key = jax.random.PRNGKey(0)
    w1, b1, w2, b2 = init_params(key, n_features, n_hidden, n_output)

    x = jnp.linspace(-1.0, 1.0, n_points, dtype=jnp.float32).reshape(n_points, 1)

    y = net_forward(x, w1, b1, w2, b2)
    y = jax.block_until_ready(y)

    # Reference check in plain JAX (original, untransposed math).
    y_ref = jnp.maximum(x @ w1 + b1, 0.0) @ w2 + b2
    assert y.shape == (n_points, n_output)
    assert jnp.allclose(y, y_ref, atol=1e-5, rtol=1e-5)

    print("KERNEL_OK")
</pallas_src>

<mosaic_0001>
module attributes {stable_mosaic.version = 11 : i64} {
  func.func @mlp_kernel(%arg0: memref<1x128xf32, #tpu.memory_space<vmem>>, %arg1: memref<32x4xf32, #tpu.memory_space<vmem>>, %arg2: memref<1x128xf32, #tpu.memory_space<vmem>>) attributes {dimension_semantics = [], scalar_prefetch = 0 : i64, scratch_operands = 0 : i64, tpu.core_type = #tpu.core_type<tc>} {
    %c0 = arith.constant 0 : index
    %c0_0 = arith.constant 0 : index
    %0 = vector.load %arg0[%c0, %c0_0] : memref<1x128xf32, #tpu.memory_space<vmem>>, vector<1x128xf32>
    %c0_1 = arith.constant 0 : index
    %c0_2 = arith.constant 0 : index
    %1 = vector.load %arg1[%c0_1, %c0_2] : memref<32x4xf32, #tpu.memory_space<vmem>>, vector<32x4xf32>
    %2 = vector.extract_strided_slice %1 {offsets = [0, 0], sizes = [32, 1], strides = [1, 1]} : vector<32x4xf32> to vector<32x1xf32>
    %3 = vector.extract_strided_slice %1 {offsets = [0, 1], sizes = [32, 1], strides = [1, 1]} : vector<32x4xf32> to vector<32x1xf32>
    %4 = vector.extract_strided_slice %1 {offsets = [0, 2], sizes = [32, 1], strides = [1, 1]} : vector<32x4xf32> to vector<32x1xf32>
    %5 = vector.extract_strided_slice %1 {offsets = [0, 3], sizes = [1, 1], strides = [1, 1]} : vector<32x4xf32> to vector<1x1xf32>
    %6 = vector.broadcast %2 : vector<32x1xf32> to vector<32x128xf32>
    %7 = vector.broadcast %0 : vector<1x128xf32> to vector<32x128xf32>
    %8 = arith.mulf %6, %7 : vector<32x128xf32>
    %9 = vector.broadcast %3 : vector<32x1xf32> to vector<32x128xf32>
    %10 = arith.addf %8, %9 : vector<32x128xf32>
    %cst = arith.constant 0.000000e+00 : f32
    %11 = vector.broadcast %cst : f32 to vector<32x128xf32>
    %12 = arith.maximumf %10, %11 : vector<32x128xf32>
    %13 = vector.broadcast %4 : vector<32x1xf32> to vector<32x128xf32>
    %14 = arith.mulf %12, %13 : vector<32x128xf32>
    %cst_3 = arith.constant dense<0.000000e+00> : vector<128xf32>
    %15 = vector.multi_reduction <add>, %14, %cst_3 [0] : vector<32x128xf32> to vector<128xf32>
    %16 = vector.shape_cast %15 : vector<128xf32> to vector<1x128xf32>
    %17 = vector.broadcast %5 : vector<1x1xf32> to vector<1x128xf32>
    %18 = arith.addf %16, %17 : vector<1x128xf32>
    %c0_4 = arith.constant 0 : index
    %c0_5 = arith.constant 0 : index
    %19 = vector.load %arg2[%c0_4, %c0_5] : memref<1x128xf32, #tpu.memory_space<vmem>>, vector<1x128xf32>
    tpu.vector_store %arg2[%c0_4, %c0_5], %18 {strides = array<i32>} : memref<1x128xf32, #tpu.memory_space<vmem>>, vector<1x128xf32>,
    return
  }
}

</mosaic_0001>

<bundles_post_ra>
// kernel: tpu_custom_call.1
= control target key start
LH: loop header
LB: loop body
LE: loop exit
PB: predicated region body
PF: predicated region fallthrough
CT: control target
= control target key end

     0   :  { %v162_v2 = vmov 0   ;;  %s200_s0 = inlined_call_operand.vmem [shape: f32[1,128], index: 0, kind: input, shape index: {}]   ;;  %s201_s1 = inlined_call_operand.vmem [shape: f32[32,4], index: 1, kind: input, shape index: {}]   ;;  %s202_s2 = inlined_call_operand.hbm [shape: f32[1,128], index: 2, kind: output, shape index: {}]  }
   0x1   :  { %v15_v0 = vld [vmem:[%s201_s1 + $0x10] sm:$0xff]  ;;  %v13_v1 = vld [vmem:[%s201_s1] sm:$0xff]  ;;  %125 = vset.pattern.permute.xlu1 %v162_v2  ;;  %124 = vset.pattern.permute.xlu0 %v162_v2 }
   0x2   :  { %7 = vsyncpa [#allocation3], 0  ;;  %29 = vperm.xlu1 %125, %v15_v0   ;;  %19 = vperm.xlu0 %124, %v13_v1   ;;  %v14_v3 = vld [vmem:[%s201_s1 + $0x8] sm:$0xff]  ;;  %v163_v4 = vmov 1   ;;  %v16_v5 = vld [vmem:[%s201_s1 + $0x18] sm:$0xff]  ;;  %v164_v6 = vmov 2  }
   0x3   :  { %127 = vset.pattern.permute.xlu2 %v163_v4  ;;  %v165_v7 = vmov 3   ;;  %v135_v14 = vld [vmem:[%s200_s0] ss:$0 sm:$0xff]  ;;  %s166_s0 = smov [#allocation2]   ;;  %s110_s21 = sshll.u32 %s202_s2, 4  ;;  %s111_s21 = int_to_ptr.hbm [resolvable:$true] %s110_s21 }
   0x4   :  { %49 = vperm.xlu2 %127, %v14_v3   ;;  %s108_s18 = sshll.u32 %s166_s0, 4  ;;  %s109_s18 = int_to_ptr.vmem [resolvable:$true] %s108_s18 }
   0xa   :  { %126 = vset.pattern.permute.xlu1 %v163_v4  ;;  %24 = vperm.xlu0 %124, %v14_v3  }
   0xb   :  { %45 = vperm.xlu1 %126, %v13_v1  }
   0xc   :  { %128 = vset.pattern.permute.xlu2 %v162_v2 }
   0xd   :  { %34 = vperm.xlu2 %128, %v16_v5  }
  0x12   :  { %129 = vset.pattern.permute.xlu0 %v163_v4 }
  0x13   :  { %57 = vperm.xlu1 %126, %v16_v5   ;;  %53 = vperm.xlu0 %129, %v15_v0  }
  0x15   :  { %130 = vset.pattern.permute.xlu2 %v164_v6 }
  0x16   :  { %69 = vperm.xlu2 %130, %v13_v1  }
  0x1b   :  { %131 = vset.pattern.permute.xlu1 %v164_v6  ;;  %132 = vset.pattern.permute.xlu0 %v164_v6 }
  0x1c   :  { %73 = vperm.xlu1 %131, %v14_v3   ;;  %81 = vperm.xlu0 %132, %v16_v5  }
  0x1e   :  { %77 = vperm.xlu2 %130, %v15_v0  }
  0x24   :  { %133 = vset.pattern.permute.xlu1 %v165_v7  ;;  %134 = vset.pattern.permute.xlu0 %v165_v7 }
  0x25   :  { %98 = vperm.xlu1 %133, %v13_v1  }
  0x5e   :  { %v50_v8 = vpop.permute.xlu2 %49 }
  0x67   :  { %v35_v11 = vpop.permute.xlu2 %34 }
  0x68   :  { %v43_v24 = vmul.f32 %v135_v14, %v35_v11 }
  0x70   :  { %v70_v15 = vpop.permute.xlu2 %69 }
  0x74   :  { %v30_v9 = vpop.permute.xlu1 %29  ;;  %v20_v10 = vpop.permute.xlu0 %19 }
  0x75   :  { %v40_v16 = vmul.f32 %v135_v14, %v20_v10  ;;  %v42_v20 = vmul.f32 %v135_v14, %v30_v9 }
  0x78   :  { %v78_v29 = vpop.permute.xlu2 %77 }
  0x7c   :  { %v25_v12 = vpop.permute.xlu0 %24 }
  0x7d   :  { %v46_v13 = vpop.permute.xlu1 %45  ;;  %v41_v17 = vmul.f32 %v135_v14, %v25_v12 }
  0x7e   :  { %v60_v21 = vadd.f32 %v46_v13, %v40_v16 }
  0x7f   :  { %v61_v22 = vadd.f32 %v50_v8, %v41_v17 }
  0x80   :  { %v64_v25 = vmax.f32 %v60_v21, 0.0 }
  0x81   :  { %v65_v28 = vmax.f32 %v61_v22, 0.0 }
  0x82   :  { %v84_v31 = vmul.f32 %v70_v15, %v64_v25 }
  0x85   :  { %v58_v18 = vpop.permute.xlu1 %57  ;;  %v54_v19 = vpop.permute.xlu0 %53 }
  0x86   :  { %v62_v23 = vadd.f32 %v54_v19, %v42_v20  ;;  %v63_v26 = vadd.f32 %v58_v18, %v43_v24 }
  0x88   :  { %v66_v27 = vmax.f32 %v62_v23, 0.0  ;;  %v67_v34 = vmax.f32 %v63_v26, 0.0 }
  0x8a   :  { %v86_v35 = vmul.f32 %v78_v29, %v66_v27 }
  0x8e   :  { %v74_v30 = vpop.permute.xlu1 %73  ;;  %v82_v33 = vpop.permute.xlu0 %81 }
  0x8f   :  { %v85_v32 = vmul.f32 %v74_v30, %v65_v28  ;;  %v87_v37 = vmul.f32 %v82_v33, %v67_v34 }
  0x91   :  { %v88_v36 = vadd.f32 %v85_v32, %v84_v31 }
  0x93   :  { %v89_v38 = vadd.f32 %v88_v36, %v86_v35 }
  0x95   :  { %v90_v39 = vadd.f32 %v89_v38, %v87_v37 }
  0x97   :  { %v91_v40 = vrot.slane %v90_v39, 4  ;;  %v99_v45 = vpop.permute.xlu1 %98 }
  0x99   :  { %v92_v41 = vadd.f32 %v91_v40, %v90_v39 }
  0x9b   :  { %v93_v42 = vrot.slane %v92_v41, 2 }
  0x9d   :  { %v94_v43 = vadd.f32 %v93_v42, %v92_v41 }
  0x9f   :  { %v95_v44 = vrot.slane %v94_v43, 1 }
  0xa1   :  { %v96_v46 = vadd.f32 %v95_v44, %v94_v43 }
  0xa3   :  { %v101_v47 = vadd.f32 %v99_v45, %v96_v46 }
  0xa5   :  { %102 = vst [vmem:[#allocation2] sm:$0x1] %v101_v47 }
  0xa6   :  { %113 = dma.vmem_to_hbm [thread:$0]  %s109_s18, 16, %s111_s21, [#allocation3]  }
  0xa7   :  { %160 = dma.done.wait [#allocation3], 16  }
  0xa8   :  { %161 = vsyncadd [#allocation3], 4294967280 }
  0xa9   :  { %118 = vsyncpa [#allocation3], 1 }

</bundles_post_ra>
